<compile_context>
chip_gen: v7x
topology: tpu7x:2x2x1
jax: 0.10.0
libtpu: 0.0.40
codegen_flags: <defaults>
</compile_context>

<pallas_src>
import functools

import jax
import jax.numpy as jnp
from jax import lax
from jax.experimental import pallas as pl
from jax.experimental.pallas import tpu as pltpu


def _mlp_kernel(x_ref, w1_ref, b1_ref, w2_ref, b2_ref, w3_ref, b3_ref, o_ref):
    # x_ref : (TILE_B, D_in)  VMEM   (natural row-major batch tile)
    # w1_ref: (H, D_in)       VMEM   (PyTorch fc1.weight layout)
    # b1,w2(flat),b2,w3(flat),b3     SMEM (scalar reads)
    # o_ref : (1, TILE_B)     VMEM   (lane-dense output slab)
    hidden = w1_ref.shape[0]

    # ---- fc1 on the MXU: contract D_in of w1 (H, D_in) with D_in of x (TILE_B, D_in)
    #      -> (H, TILE_B), i.e. batch lands on lanes.
    h1 = lax.dot_general(
        w1_ref[...], x_ref[...],
        dimension_numbers=(((1,), (1,)), ((), ())),
        preferred_element_type=jnp.float32)

    # bias + ReLU; split into lane-dense (1, TILE_B) rows for the VPU layers below.
    r1 = [jnp.maximum(h1[j:j + 1, :] + b1_ref[j], 0.0) for j in range(hidden)]

    # ---- fc2 + ReLU on the VPU: 5x5 contraction as scalar-broadcast FMAs.
    r2 = []
    for j in range(hidden):
        acc = r1[0] * w2_ref[j * hidden + 0]
        for i in range(1, hidden):
            acc = acc + r1[i] * w2_ref[j * hidden + i]
        r2.append(jnp.maximum(acc + b2_ref[j], 0.0))

    # ---- fc3 + sigmoid: 5x1 contraction as FMAs; exp runs on the EUP slot.
    logit = r2[0] * w3_ref[0]
    for i in range(1, hidden):
        logit = logit + r2[i] * w3_ref[i]
    logit = logit + b3_ref[0]
    # Exact sigmoid to match the PyTorch reference tightly.
    o_ref[...] = 1.0 / (1.0 + jnp.exp(-logit))


@functools.partial(jax.jit, static_argnames=("tile_b",))
def simple_transaction_mlp(x, params, *, tile_b=2048):
    """x: (B, input_dim) float32 -> (B, 1) float32 probabilities."""
    w1, b1, w2, b2, w3, b3 = params
    B, d_in = x.shape
    hidden = w1.shape[0]

    # Batch maps to lanes inside the kernel; tile must be a multiple of 128.
    tile_b = max(128, (int(tile_b) // 128) * 128)
    tile_b = min(tile_b, pl.cdiv(B, 128) * 128)
    b_pad = pl.cdiv(B, tile_b) * tile_b
    grid = (b_pad // tile_b,)

    x_f32 = jnp.asarray(x, jnp.float32)
    if b_pad != B:
        x_f32 = jnp.pad(x_f32, ((0, b_pad - B), (0, 0)))      # zero-pad batch rows

    smem = pl.BlockSpec(memory_space=pltpu.MemorySpace.SMEM)

    param_bytes = 4 * int(w1.size + b1.size + w2.size + b2.size + w3.size + b3.size)
    flops = 2 * b_pad * (d_in * hidden + hidden * hidden + hidden)
    bytes_accessed = b_pad * (d_in + 1) * 4 + param_bytes

    out = pl.pallas_call(
        _mlp_kernel,
        out_shape=jax.ShapeDtypeStruct((1, b_pad), jnp.float32),
        grid=grid,
        in_specs=[
            pl.BlockSpec((tile_b, d_in), lambda i: (i, 0)),    # x tile (pipelined)
            pl.BlockSpec((hidden, d_in), lambda i: (0, 0)),    # fc1 weight, VMEM-resident
            smem,                                              # b1 (H,)
            smem,                                              # w2 flattened (H*H,)
            smem,                                              # b2 (H,)
            smem,                                              # w3 flattened (H,)
            smem,                                              # b3 (1,)
        ],
        out_specs=pl.BlockSpec((1, tile_b), lambda i: (0, i)),
        compiler_params=pltpu.CompilerParams(
            dimension_semantics=("parallel",)),
        cost_estimate=pl.CostEstimate(
            flops=flops, transcendentals=b_pad, bytes_accessed=bytes_accessed),
    )(x_f32,
      jnp.asarray(w1, jnp.float32),
      jnp.asarray(b1, jnp.float32),
      jnp.asarray(w2, jnp.float32).reshape(hidden * hidden),
      jnp.asarray(b2, jnp.float32),
      jnp.asarray(w3, jnp.float32).reshape(hidden),
      jnp.asarray(b3, jnp.float32))

    return out[0, :B].reshape(B, 1)


def init_params(key, input_dim=15, hidden=5):
    """PyTorch nn.Linear default init: uniform +/- 1/sqrt(fan_in).
    Weights stored (out_features, in_features); biases (out_features,)."""
    def linear(key, fan_in, fan_out):
        kw, kb = jax.random.split(key)
        bound = 1.0 / jnp.sqrt(float(fan_in))
        w = jax.random.uniform(kw, (fan_out, fan_in), jnp.float32, -bound, bound)
        b = jax.random.uniform(kb, (fan_out,), jnp.float32, -bound, bound)
        return w, b

    k1, k2, k3 = jax.random.split(key, 3)
    w1, b1 = linear(k1, input_dim, hidden)
    w2, b2 = linear(k2, hidden, hidden)
    w3, b3 = linear(k3, hidden, 1)
    return (w1, b1, w2, b2, w3, b3)


def _reference(x, params):
    w1, b1, w2, b2, w3, b3 = params
    h = jnp.maximum(x @ w1.T + b1, 0.0)
    h = jnp.maximum(h @ w2.T + b2, 0.0)
    z = h @ w3.T + b3
    return 1.0 / (1.0 + jnp.exp(-z))


if __name__ == "__main__":
    key = jax.random.PRNGKey(0)
    kx, kp = jax.random.split(key)

    batch, input_dim = 8, 15
    x = jax.random.normal(kx, (batch, input_dim), dtype=jnp.float32)
    params = init_params(kp, input_dim=input_dim)

    out = jax.block_until_ready(simple_transaction_mlp(x, params))
    ref = _reference(x, params)

    assert out.shape == (batch, 1)
    assert jnp.allclose(out, ref, atol=1e-5, rtol=1e-5)

    print("KERNEL_OK")
</pallas_src>

<mosaic_0001>
module attributes {stable_mosaic.version = 11 : i64} {
  func.func @_mlp_kernel(%arg0: i32, %arg1: memref<128x15xf32, #tpu.memory_space<vmem>>, %arg2: memref<5x15xf32, #tpu.memory_space<vmem>>, %arg3: memref<5xf32, #tpu.memory_space<smem>>, %arg4: memref<25xf32, #tpu.memory_space<smem>>, %arg5: memref<5xf32, #tpu.memory_space<smem>>, %arg6: memref<5xf32, #tpu.memory_space<smem>>, %arg7: memref<1xf32, #tpu.memory_space<smem>>, %arg8: memref<1x128xf32, #tpu.memory_space<vmem>>) attributes {dimension_semantics = [#tpu.dimension_semantics<parallel>], iteration_bounds = array<i64: 1>, scalar_prefetch = 0 : i64, scratch_operands = 0 : i64, tpu.core_type = #tpu.core_type<tc>, window_params = [{transform_indices = @transform_0, window_bounds = array<i64: 128, 15>}, {pipeline_mode = #tpu.pipeline_mode<synchronous>, transform_indices = @transform_1, window_bounds = array<i64: 5, 15>}, {transform_indices = @transform_2, window_bounds = array<i64: 5>}, {transform_indices = @transform_3, window_bounds = array<i64: 25>}, {transform_indices = @transform_4, window_bounds = array<i64: 5>}, {transform_indices = @transform_5, window_bounds = array<i64: 5>}, {transform_indices = @transform_6, window_bounds = array<i64: 1>}, {transform_indices = @transform_7, window_bounds = array<i64: 1, 128>}]} {
    %c0 = arith.constant 0 : index
    %c0_0 = arith.constant 0 : index
    %0 = vector.load %arg2[%c0, %c0_0] : memref<5x15xf32, #tpu.memory_space<vmem>>, vector<5x15xf32>
    %c0_1 = arith.constant 0 : index
    %c0_2 = arith.constant 0 : index
    %1 = vector.load %arg1[%c0_1, %c0_2] : memref<128x15xf32, #tpu.memory_space<vmem>>, vector<128x15xf32>
    %cst = arith.constant dense<0.000000e+00> : vector<5x128xf32>
    %2 = tpu.matmul %0, %1, %cst {dimension_numbers = #tpu.dot_dimension_numbers<[1], [1], [0], [0], [0, 0, 1, 0], [], []>} : vector<5x15xf32>, vector<128x15xf32>, vector<5x128xf32> -> vector<5x128xf32>
    %3 = vector.extract_strided_slice %2 {offsets = [0, 0], sizes = [1, 128], strides = [1, 1]} : vector<5x128xf32> to vector<1x128xf32>
    %c0_3 = arith.constant 0 : index
    %4 = memref.load %arg3[%c0_3] : memref<5xf32, #tpu.memory_space<smem>>
    %5 = vector.broadcast %4 : f32 to vector<1x128xf32>
    %6 = arith.addf %3, %5 : vector<1x128xf32>
    %cst_4 = arith.constant 0.000000e+00 : f32
    %7 = vector.broadcast %cst_4 : f32 to vector<1x128xf32>
    %8 = arith.maximumf %6, %7 : vector<1x128xf32>
    %9 = vector.extract_strided_slice %2 {offsets = [1, 0], sizes = [1, 128], strides = [1, 1]} : vector<5x128xf32> to vector<1x128xf32>
    %c1 = arith.constant 1 : index
    %10 = memref.load %arg3[%c1] : memref<5xf32, #tpu.memory_space<smem>>
    %11 = vector.broadcast %10 : f32 to vector<1x128xf32>
    %12 = arith.addf %9, %11 : vector<1x128xf32>
    %cst_5 = arith.constant 0.000000e+00 : f32
    %13 = vector.broadcast %cst_5 : f32 to vector<1x128xf32>
    %14 = arith.maximumf %12, %13 : vector<1x128xf32>
    %15 = vector.extract_strided_slice %2 {offsets = [2, 0], sizes = [1, 128], strides = [1, 1]} : vector<5x128xf32> to vector<1x128xf32>
    %c2 = arith.constant 2 : index
    %16 = memref.load %arg3[%c2] : memref<5xf32, #tpu.memory_space<smem>>
    %17 = vector.broadcast %16 : f32 to vector<1x128xf32>
    %18 = arith.addf %15, %17 : vector<1x128xf32>
    %cst_6 = arith.constant 0.000000e+00 : f32
    %19 = vector.broadcast %cst_6 : f32 to vector<1x128xf32>
    %20 = arith.maximumf %18, %19 : vector<1x128xf32>
    %21 = vector.extract_strided_slice %2 {offsets = [3, 0], sizes = [1, 128], strides = [1, 1]} : vector<5x128xf32> to vector<1x128xf32>
    %c3 = arith.constant 3 : index
    %22 = memref.load %arg3[%c3] : memref<5xf32, #tpu.memory_space<smem>>
    %23 = vector.broadcast %22 : f32 to vector<1x128xf32>
    %24 = arith.addf %21, %23 : vector<1x128xf32>
    %cst_7 = arith.constant 0.000000e+00 : f32
    %25 = vector.broadcast %cst_7 : f32 to vector<1x128xf32>
    %26 = arith.maximumf %24, %25 : vector<1x128xf32>
    %27 = vector.extract_strided_slice %2 {offsets = [4, 0], sizes = [1, 128], strides = [1, 1]} : vector<5x128xf32> to vector<1x128xf32>
    %c4 = arith.constant 4 : index
    %28 = memref.load %arg3[%c4] : memref<5xf32, #tpu.memory_space<smem>>
    %29 = vector.broadcast %28 : f32 to vector<1x128xf32>
    %30 = arith.addf %27, %29 : vector<1x128xf32>
    %cst_8 = arith.constant 0.000000e+00 : f32
    %31 = vector.broadcast %cst_8 : f32 to vector<1x128xf32>
    %32 = arith.maximumf %30, %31 : vector<1x128xf32>
    %c0_9 = arith.constant 0 : index
    %33 = memref.load %arg4[%c0_9] : memref<25xf32, #tpu.memory_space<smem>>
    %34 = vector.broadcast %33 : f32 to vector<1x128xf32>
    %35 = arith.mulf %8, %34 : vector<1x128xf32>
    %c1_10 = arith.constant 1 : index
    %36 = memref.load %arg4[%c1_10] : memref<25xf32, #tpu.memory_space<smem>>
    %37 = vector.broadcast %36 : f32 to vector<1x128xf32>
    %38 = arith.mulf %14, %37 : vector<1x128xf32>
    %39 = arith.addf %35, %38 : vector<1x128xf32>
    %c2_11 = arith.constant 2 : index
    %40 = memref.load %arg4[%c2_11] : memref<25xf32, #tpu.memory_space<smem>>
    %41 = vector.broadcast %40 : f32 to vector<1x128xf32>
    %42 = arith.mulf %20, %41 : vector<1x128xf32>
    %43 = arith.addf %39, %42 : vector<1x128xf32>
    %c3_12 = arith.constant 3 : index
    %44 = memref.load %arg4[%c3_12] : memref<25xf32, #tpu.memory_space<smem>>
    %45 = vector.broadcast %44 : f32 to vector<1x128xf32>
    %46 = arith.mulf %26, %45 : vector<1x128xf32>
    %47 = arith.addf %43, %46 : vector<1x128xf32>
    %c4_13 = arith.constant 4 : index
    %48 = memref.load %arg4[%c4_13] : memref<25xf32, #tpu.memory_space<smem>>
    %49 = vector.broadcast %48 : f32 to vector<1x128xf32>
    %50 = arith.mulf %32, %49 : vector<1x128xf32>
    %51 = arith.addf %47, %50 : vector<1x128xf32>
    %c0_14 = arith.constant 0 : index
    %52 = memref.load %arg5[%c0_14] : memref<5xf32, #tpu.memory_space<smem>>
    %53 = vector.broadcast %52 : f32 to vector<1x128xf32>
    %54 = arith.addf %51, %53 : vector<1x128xf32>
    %cst_15 = arith.constant 0.000000e+00 : f32
    %55 = vector.broadcast %cst_15 : f32 to vector<1x128xf32>
    %56 = arith.maximumf %54, %55 : vector<1x128xf32>
    %c5 = arith.constant 5 : index
    %57 = memref.load %arg4[%c5] : memref<25xf32, #tpu.memory_space<smem>>
    %58 = vector.broadcast %57 : f32 to vector<1x128xf32>
    %59 = arith.mulf %8, %58 : vector<1x128xf32>
    %c6 = arith.constant 6 : index
    %60 = memref.load %arg4[%c6] : memref<25xf32, #tpu.memory_space<smem>>
    %61 = vector.broadcast %60 : f32 to vector<1x128xf32>
    %62 = arith.mulf %14, %61 : vector<1x128xf32>
    %63 = arith.addf %59, %62 : vector<1x128xf32>
    %c7 = arith.constant 7 : index
    %64 = memref.load %arg4[%c7] : memref<25xf32, #tpu.memory_space<smem>>
    %65 = vector.broadcast %64 : f32 to vector<1x128xf32>
    %66 = arith.mulf %20, %65 : vector<1x128xf32>
    %67 = arith.addf %63, %66 : vector<1x128xf32>
    %c8 = arith.constant 8 : index
    %68 = memref.load %arg4[%c8] : memref<25xf32, #tpu.memory_space<smem>>
    %69 = vector.broadcast %68 : f32 to vector<1x128xf32>
    %70 = arith.mulf %26, %69 : vector<1x128xf32>
    %71 = arith.addf %67, %70 : vector<1x128xf32>
    %c9 = arith.constant 9 : index
    %72 = memref.load %arg4[%c9] : memref<25xf32, #tpu.memory_space<smem>>
    %73 = vector.broadcast %72 : f32 to vector<1x128xf32>
    %74 = arith.mulf %32, %73 : vector<1x128xf32>
    %75 = arith.addf %71, %74 : vector<1x128xf32>
    %c1_16 = arith.constant 1 : index
    %76 = memref.load %arg5[%c1_16] : memref<5xf32, #tpu.memory_space<smem>>
    %77 = vector.broadcast %76 : f32 to vector<1x128xf32>
    %78 = arith.addf %75, %77 : vector<1x128xf32>
    %cst_17 = arith.constant 0.000000e+00 : f32
    %79 = vector.broadcast %cst_17 : f32 to vector<1x128xf32>
    %80 = arith.maximumf %78, %79 : vector<1x128xf32>
    %c10 = arith.constant 10 : index
    %81 = memref.load %arg4[%c10] : memref<25xf32, #tpu.memory_space<smem>>
    %82 = vector.broadcast %81 : f32 to vector<1x128xf32>
    %83 = arith.mulf %8, %82 : vector<1x128xf32>
    %c11 = arith.constant 11 : index
    %84 = memref.load %arg4[%c11] : memref<25xf32, #tpu.memory_space<smem>>
    %85 = vector.broadcast %84 : f32 to vector<1x128xf32>
    %86 = arith.mulf %14, %85 : vector<1x128xf32>
    %87 = arith.addf %83, %86 : vector<1x128xf32>
    %c12 = arith.constant 12 : index
    %88 = memref.load %arg4[%c12] : memref<25xf32, #tpu.memory_space<smem>>
    %89 = vector.broadcast %88 : f32 to vector<1x128xf32>
    %90 = arith.mulf %20, %89 : vector<1x128xf32>
    %91 = arith.addf %87, %90 : vector<1x128xf32>
    %c13 = arith.constant 13 : index
    %92 = memref.load %arg4[%c13] : memref<25xf32, #tpu.memory_space<smem>>
    %93 = vector.broadcast %92 : f32 to vector<1x128xf32>
    %94 = arith.mulf %26, %93 : vector<1x128xf32>
    %95 = arith.addf %91, %94 : vector<1x128xf32>
    %c14 = arith.constant 14 : index
    %96 = memref.load %arg4[%c14] : memref<25xf32, #tpu.memory_space<smem>>
    %97 = vector.broadcast %96 : f32 to vector<1x128xf32>
    %98 = arith.mulf %32, %97 : vector<1x128xf32>
    %99 = arith.addf %95, %98 : vector<1x128xf32>
    %c2_18 = arith.constant 2 : index
    %100 = memref.load %arg5[%c2_18] : memref<5xf32, #tpu.memory_space<smem>>
    %101 = vector.broadcast %100 : f32 to vector<1x128xf32>
    %102 = arith.addf %99, %101 : vector<1x128xf32>
    %cst_19 = arith.constant 0.000000e+00 : f32
    %103 = vector.broadcast %cst_19 : f32 to vector<1x128xf32>
    %104 = arith.maximumf %102, %103 : vector<1x128xf32>
    %c15 = arith.constant 15 : index
    %105 = memref.load %arg4[%c15] : memref<25xf32, #tpu.memory_space<smem>>
    %106 = vector.broadcast %105 : f32 to vector<1x128xf32>
    %107 = arith.mulf %8, %106 : vector<1x128xf32>
    %c16 = arith.constant 16 : index
    %108 = memref.load %arg4[%c16] : memref<25xf32, #tpu.memory_space<smem>>
    %109 = vector.broadcast %108 : f32 to vector<1x128xf32>
    %110 = arith.mulf %14, %109 : vector<1x128xf32>
    %111 = arith.addf %107, %110 : vector<1x128xf32>
    %c17 = arith.constant 17 : index
    %112 = memref.load %arg4[%c17] : memref<25xf32, #tpu.memory_space<smem>>
    %113 = vector.broadcast %112 : f32 to vector<1x128xf32>
    %114 = arith.mulf %20, %113 : vector<1x128xf32>
    %115 = arith.addf %111, %114 : vector<1x128xf32>
    %c18 = arith.constant 18 : index
    %116 = memref.load %arg4[%c18] : memref<25xf32, #tpu.memory_space<smem>>
    %117 = vector.broadcast %116 : f32 to vector<1x128xf32>
    %118 = arith.mulf %26, %117 : vector<1x128xf32>
    %119 = arith.addf %115, %118 : vector<1x128xf32>
    %c19 = arith.constant 19 : index
    %120 = memref.load %arg4[%c19] : memref<25xf32, #tpu.memory_space<smem>>
    %121 = vector.broadcast %120 : f32 to vector<1x128xf32>
    %122 = arith.mulf %32, %121 : vector<1x128xf32>
    %123 = arith.addf %119, %122 : vector<1x128xf32>
    %c3_20 = arith.constant 3 : index
    %124 = memref.load %arg5[%c3_20] : memref<5xf32, #tpu.memory_space<smem>>
    %125 = vector.broadcast %124 : f32 to vector<1x128xf32>
    %126 = arith.addf %123, %125 : vector<1x128xf32>
    %cst_21 = arith.constant 0.000000e+00 : f32
    %127 = vector.broadcast %cst_21 : f32 to vector<1x128xf32>
    %128 = arith.maximumf %126, %127 : vector<1x128xf32>
    %c20 = arith.constant 20 : index
    %129 = memref.load %arg4[%c20] : memref<25xf32, #tpu.memory_space<smem>>
    %130 = vector.broadcast %129 : f32 to vector<1x128xf32>
    %131 = arith.mulf %8, %130 : vector<1x128xf32>
    %c21 = arith.constant 21 : index
    %132 = memref.load %arg4[%c21] : memref<25xf32, #tpu.memory_space<smem>>
    %133 = vector.broadcast %132 : f32 to vector<1x128xf32>
    %134 = arith.mulf %14, %133 : vector<1x128xf32>
    %135 = arith.addf %131, %134 : vector<1x128xf32>
    %c22 = arith.constant 22 : index
    %136 = memref.load %arg4[%c22] : memref<25xf32, #tpu.memory_space<smem>>
    %137 = vector.broadcast %136 : f32 to vector<1x128xf32>
    %138 = arith.mulf %20, %137 : vector<1x128xf32>
    %139 = arith.addf %135, %138 : vector<1x128xf32>
    %c23 = arith.constant 23 : index
    %140 = memref.load %arg4[%c23] : memref<25xf32, #tpu.memory_space<smem>>
    %141 = vector.broadcast %140 : f32 to vector<1x128xf32>
    %142 = arith.mulf %26, %141 : vector<1x128xf32>
    %143 = arith.addf %139, %142 : vector<1x128xf32>
    %c24 = arith.constant 24 : index
    %144 = memref.load %arg4[%c24] : memref<25xf32, #tpu.memory_space<smem>>
    %145 = vector.broadcast %144 : f32 to vector<1x128xf32>
    %146 = arith.mulf %32, %145 : vector<1x128xf32>
    %147 = arith.addf %143, %146 : vector<1x128xf32>
    %c4_22 = arith.constant 4 : index
    %148 = memref.load %arg5[%c4_22] : memref<5xf32, #tpu.memory_space<smem>>
    %149 = vector.broadcast %148 : f32 to vector<1x128xf32>
    %150 = arith.addf %147, %149 : vector<1x128xf32>
    %cst_23 = arith.constant 0.000000e+00 : f32
    %151 = vector.broadcast %cst_23 : f32 to vector<1x128xf32>
    %152 = arith.maximumf %150, %151 : vector<1x128xf32>
    %c0_24 = arith.constant 0 : index
    %153 = memref.load %arg6[%c0_24] : memref<5xf32, #tpu.memory_space<smem>>
    %154 = vector.broadcast %153 : f32 to vector<1x128xf32>
    %155 = arith.mulf %56, %154 : vector<1x128xf32>
    %c1_25 = arith.constant 1 : index
    %156 = memref.load %arg6[%c1_25] : memref<5xf32, #tpu.memory_space<smem>>
    %157 = vector.broadcast %156 : f32 to vector<1x128xf32>
    %158 = arith.mulf %80, %157 : vector<1x128xf32>
    %159 = arith.addf %155, %158 : vector<1x128xf32>
    %c2_26 = arith.constant 2 : index
    %160 = memref.load %arg6[%c2_26] : memref<5xf32, #tpu.memory_space<smem>>
    %161 = vector.broadcast %160 : f32 to vector<1x128xf32>
    %162 = arith.mulf %104, %161 : vector<1x128xf32>
    %163 = arith.addf %159, %162 : vector<1x128xf32>
    %c3_27 = arith.constant 3 : index
    %164 = memref.load %arg6[%c3_27] : memref<5xf32, #tpu.memory_space<smem>>
    %165 = vector.broadcast %164 : f32 to vector<1x128xf32>
    %166 = arith.mulf %128, %165 : vector<1x128xf32>
    %167 = arith.addf %163, %166 : vector<1x128xf32>
    %c4_28 = arith.constant 4 : index
    %168 = memref.load %arg6[%c4_28] : memref<5xf32, #tpu.memory_space<smem>>
    %169 = vector.broadcast %168 : f32 to vector<1x128xf32>
    %170 = arith.mulf %152, %169 : vector<1x128xf32>
    %171 = arith.addf %167, %170 : vector<1x128xf32>
    %c0_29 = arith.constant 0 : index
    %172 = memref.load %arg7[%c0_29] : memref<1xf32, #tpu.memory_space<smem>>
    %173 = vector.broadcast %172 : f32 to vector<1x128xf32>
    %174 = arith.addf %171, %173 : vector<1x128xf32>
    %cst_30 = arith.constant 0.000000e+00 : f32
    %175 = vector.broadcast %cst_30 : f32 to vector<1x128xf32>
    %176 = arith.subf %175, %174 : vector<1x128xf32>
    %177 = math.exp %176 : vector<1x128xf32>
    %cst_31 = arith.constant 1.000000e+00 : f32
    %178 = vector.broadcast %cst_31 : f32 to vector<1x128xf32>
    %179 = arith.addf %178, %177 : vector<1x128xf32>
    %cst_32 = arith.constant 1.000000e+00 : f32
    %180 = vector.broadcast %cst_32 : f32 to vector<1x128xf32>
    %181 = arith.divf %180, %179 : vector<1x128xf32>
    %c0_33 = arith.constant 0 : index
    %c0_34 = arith.constant 0 : index
    %182 = vector.load %arg8[%c0_33, %c0_34] : memref<1x128xf32, #tpu.memory_space<vmem>>, vector<1x128xf32>
    tpu.vector_store %arg8[%c0_33, %c0_34], %181 {strides = array<i32>} : memref<1x128xf32, #tpu.memory_space<vmem>>, vector<1x128xf32>,
    return
  }
  func.func @transform_0(%arg0: i32) -> (i32, i32) {
    %c0_i32 = arith.constant 0 : i32
    %c0_i32_0 = arith.constant 0 : i32
    return %arg0, %c0_i32 : i32, i32
  }
  func.func @transform_1(%arg0: i32) -> (i32, i32) {
    %c0_i32 = arith.constant 0 : i32
    %c0_i32_0 = arith.constant 0 : i32
    %c0_i32_1 = arith.constant 0 : i32
    return %c0_i32, %c0_i32_0 : i32, i32
  }
  func.func @transform_2(%arg0: i32) -> i32 {
    %c0_i32 = arith.constant 0 : i32
    %c0_i32_0 = arith.constant 0 : i32
    return %c0_i32 : i32
  }
  func.func @transform_3(%arg0: i32) -> i32 {
    %c0_i32 = arith.constant 0 : i32
    %c0_i32_0 = arith.constant 0 : i32
    return %c0_i32 : i32
  }
  func.func @transform_4(%arg0: i32) -> i32 {
    %c0_i32 = arith.constant 0 : i32
    %c0_i32_0 = arith.constant 0 : i32
    return %c0_i32 : i32
  }
  func.func @transform_5(%arg0: i32) -> i32 {
    %c0_i32 = arith.constant 0 : i32
    %c0_i32_0 = arith.constant 0 : i32
    return %c0_i32 : i32
  }
  func.func @transform_6(%arg0: i32) -> i32 {
    %c0_i32 = arith.constant 0 : i32
    %c0_i32_0 = arith.constant 0 : i32
    return %c0_i32 : i32
  }
  func.func @transform_7(%arg0: i32) -> (i32, i32) {
    %c0_i32 = arith.constant 0 : i32
    %c0_i32_0 = arith.constant 0 : i32
    return %c0_i32, %arg0 : i32, i32
  }
}

</mosaic_0001>

<bundles_post_ra>
// kernel: simple_transaction_mlp.1
= control target key start
LH: loop header
LB: loop body
LE: loop exit
PB: predicated region body
PF: predicated region fallthrough
CT: control target
= control target key end

     0   :  { %s942_s0 = inlined_call_operand.vmem [shape: f32[128,15], index: 0, kind: input, shape index: {}]   ;;  %s943_s1 = inlined_call_operand.vmem [shape: f32[5,15], index: 1, kind: input, shape index: {}]   ;;  %s944_s2 = inlined_call_operand.vmem [shape: f32[5], index: 2, kind: input, shape index: {}]   ;;  %s945_s3 = inlined_call_operand.vmem [shape: f32[25], index: 3, kind: input, shape index: {}]   ;;  %s946_s4 = inlined_call_operand.vmem [shape: f32[5], index: 4, kind: input, shape index: {}]   ;;  %s947_s5 = inlined_call_operand.vmem [shape: f32[5], index: 5, kind: input, shape index: {}]   ;;  %s948_s6 = inlined_call_operand.<no memory space> [shape: f32[1], index: 6, kind: input, shape index: {}]   ;;  %s949_s7 = inlined_call_operand.vmem [shape: f32[1,128], index: 7, kind: output, shape index: {}]  }
   0x1   :  { %950 = sst [smem:[#allocation13_spill]] %s948_s6 }
   0x2   :  { %951 = sst [smem:[#allocation14_spill]] %s949_s7 }
   0x3   :  { %13 = vsyncpa [#allocation4], 0 }
   0x4   :  { %14 = vsyncpa [#allocation6], 0  ;;  %s36_s26 = sshll.u32 %s945_s3, 4  ;;  %s37_s26 = int_to_ptr.vmem [resolvable:$true] %s36_s26 }
   0x5   :  { %15 = vsyncpa [#allocation9], 0  ;;  %s26_s29 = sshll.u32 %s944_s2, 4  ;;  %s593_s30 = scalar_lea.vmem %s37_s26, 16  ;;  %s27_s29 = int_to_ptr.vmem [resolvable:$true] %s26_s29 }
   0x6   :  { %p594_p0 = scmp.ne.s32.totalorder %s37_s26, %s593_s30  ;;  %p598_p1 = scmp.lt.s32.totalorder %s37_s26, %s37_s26 }
   0x7   :  { %p599_p2 = scmp.lt.s32.totalorder %s593_s30, %s593_s30 }
   0x9   :  { %p600_p3 = por %p599_p2, %p598_p1 }
   0xb   :  { %p601_p4 = pnand %p600_p3, %p594_p0 }
   0xd   :  { %604 = shalt.err (!%p601_p4)
}
   0xe   :  { %s647_s8 = smov [#allocation5]   ;;  %s605_s9 = scalar_lea.vmem %s27_s29, 16 }
   0xf   :  { %39 = dma.vmem_to_smem %s37_s26, 16, %s647_s8, [#allocation6]  }
  0x10   :  { %p606_p5 = scmp.ne.s32.totalorder %s27_s29, %s605_s9  ;;  %p610_p6 = scmp.lt.s32.totalorder %s27_s29, %s27_s29 }
  0x11   :  { %p611_p7 = scmp.lt.s32.totalorder %s605_s9, %s605_s9 }
  0x13   :  { %p612_p8 = por %p611_p7, %p610_p6 }
  0x15   :  { %p613_p9 = pnand %p612_p8, %p606_p5 }
  0x17   :  { %616 = shalt.err (!%p613_p9)
}
  0x18   :  { %s648_s3 = smov [#allocation3]   ;;  %s46_s11 = sshll.u32 %s946_s4, 4  ;;  %s47_s11 = int_to_ptr.vmem [resolvable:$true] %s46_s11 }
  0x19   :  { %29 = dma.vmem_to_smem %s27_s29, 16, %s648_s3, [#allocation4]  }
  0x1a   :  { %s56_s14 = sshll.u32 %s947_s5, 4  ;;  %s617_s15 = scalar_lea.vmem %s47_s11, 16  ;;  %s57_s14 = int_to_ptr.vmem [resolvable:$true] %s56_s14 }
  0x1b   :  { %p618_p10 = scmp.ne.s32.totalorder %s47_s11, %s617_s15  ;;  %p622_p11 = scmp.lt.s32.totalorder %s47_s11, %s47_s11 }
  0x1c   :  { %p623_p12 = scmp.lt.s32.totalorder %s617_s15, %s617_s15 }
  0x1e   :  { %p624_p13 = por %p623_p12, %p622_p11 }
  0x20   :  { %p625_p0 = pnand %p624_p13, %p618_p10 }
  0x22   :  { %628 = shalt.err (!%p625_p0)
}
  0x23   :  { %s649_s16 = smov [#allocation7]   ;;  %s629_s17 = scalar_lea.vmem %s57_s14, 16 }
  0x24   :  { %49 = dma.vmem_to_smem %s47_s11, 16, %s649_s16, [#allocation6]  }
  0x25   :  { %p630_p1 = scmp.ne.s32.totalorder %s57_s14, %s629_s17  ;;  %p634_p2 = scmp.lt.s32.totalorder %s57_s14, %s57_s14 }
  0x26   :  { %p635_p3 = scmp.lt.s32.totalorder %s629_s17, %s629_s17 }
  0x28   :  { %p636_p4 = por %p635_p3, %p634_p2 }
  0x2a   :  { %p637_p5 = pnand %p636_p4, %p630_p1 }
  0x2c   :  { %640 = shalt.err (!%p637_p5)
}
  0x2d   :  { %s650_s4 = smov [#allocation8]  }
  0x2e   :  { %59 = dma.vmem_to_smem %s57_s14, 16, %s650_s4, [#allocation9]  }
  0x2f   :  { %641 = dma.done.wait [#allocation4], 16  }
  0x30   :  { %642 = vsyncadd [#allocation4], 4294967280 }
  0x31   :  { %643 = dma.done.wait [#allocation6], 32  }
  0x32   :  { %644 = vsyncadd [#allocation6], 4294967264 }
  0x33   :  { %645 = dma.done.wait [#allocation9], 16  }
  0x34   :  { %646 = vsyncadd [#allocation9], 4294967280 }
  0x35   :  { %74 = sfence }
  0x36   :  { %v76_v0 = vld [vmem:[%s942_s0] sm:$0xff]  ;;  %v77_v1 = vld [vmem:[%s942_s0 + $0x8] sm:$0xff]  ;;  %vm92_vm0 = vcmask 121856   ;;  %v651_v2 = vmov 0.0|0.0   ;;  %vm652_vm2 = vmmov 0   ;;  %v653_v5 = vmov 0.0  }
  0x37   :  { %550 = vmatprep.subr.bf16.mxu0 %v651_v2  ;;  %v551_v3 = vpack.c.bf16 %v77_v1, %v76_v0  ;;  %vm714_vm1 = vmpackc.low %vm92_vm0, %vm92_vm0  ;;  %547 = vmatprep.mubr.msk.f32.mxu0 %vm652_vm2, %v653_v5  ;;  %v78_v6 = vld [vmem:[%s942_s0 + $0x10] sm:$0xff]  ;;  %v79_v7 = vld [vmem:[%s942_s0 + $0x18] sm:$0xff]  ;;  %s780_s24 = sld [smem:[#allocation3]]  ;;  %s782_s25 = sld [smem:[#allocation3 + $0x1]] }
  0x38   :  { %v555_v8 = vpack.c.bf16 %v79_v7, %v78_v6  ;;  %v80_v9 = vld [vmem:[%s942_s0 + $0x20] sm:$0xff]  ;;  %v81_v10 = vld [vmem:[%s942_s0 + $0x28] sm:$0xff]  ;;  %v82_v12 = vld [vmem:[%s942_s0 + $0x30] sm:$0xff]  ;;  %s784_s26 = sld [smem:[#allocation3 + $0x2]]  ;;  %s786_s27 = sld [smem:[#allocation3 + $0x3]] }
  0x39   :  { %553 = vmatpush3.bf16.xpose.msk.msra.mxu0 %vm714_vm1, %v551_v3  ;;  %v559_v11 = vpack.c.bf16 %v81_v10, %v80_v9  ;;  %v83_v13 = vld [vmem:[%s942_s0 + $0x38] sm:$0xff]  ;;  %v84_v15 = vld [vmem:[%s942_s0 + $0x40] sm:$0xff]  ;;  %v85_v16 = vld [vmem:[%s942_s0 + $0x48] sm:$0xff]  ;;  %s788_s28 = sld [smem:[#allocation3 + $0x4]]  ;;  %s792_s29 = sld [smem:[#allocation5 + $0x1]] }
  0x3a   :  { %554 = vmatprep.subr.bf16.mxu0 %v651_v2  ;;  %v563_v14 = vpack.c.bf16 %v83_v13, %v82_v12  ;;  %v567_v17 = vpack.c.bf16 %v85_v16, %v84_v15  ;;  %v86_v18 = vld [vmem:[%s942_s0 + $0x50] sm:$0xff]  ;;  %v87_v19 = vld [vmem:[%s942_s0 + $0x58] sm:$0xff]  ;;  %v88_v21 = vld [vmem:[%s942_s0 + $0x60] sm:$0xff]  ;;  %s794_s30 = sld [smem:[#allocation5 + $0x2]]  ;;  %s796_s8 = sld [smem:[#allocation5 + $0x3]] }
  0x3b   :  { %v571_v20 = vpack.c.bf16 %v87_v19, %v86_v18  ;;  %v89_v22 = vld [vmem:[%s942_s0 + $0x68] sm:$0xff]  ;;  %v90_v24 = vld [vmem:[%s942_s0 + $0x70] sm:$0xff]  ;;  %v91_v25 = vld [vmem:[%s942_s0 + $0x78] sm:$0xff]  ;;  %s790_s0 = sld [smem:[#allocation5]]  ;;  %s800_s9 = sld [smem:[#allocation5 + $0x5]] }
  0x3c   :  { %v575_v23 = vpack.c.bf16 %v89_v22, %v88_v21  ;;  %v579_v26 = vpack.c.bf16 %v91_v25, %v90_v24  ;;  %v75_v27 = vld [vmem:[%s943_s1] sm:$0x1f]  ;;  %s798_s1 = sld [smem:[#allocation5 + $0x4]]  ;;  %s802_s3 = sld [smem:[#allocation5 + $0x6]] }
  0x3d   :  { %s804_s2 = sld [smem:[#allocation5 + $0x7]]  ;;  %s806_s10 = sld [smem:[#allocation5 + $0x8]]  ;;  %v215_v28 = vstv %s780_s24  ;;  %v219_v29 = vstv %s782_s25 }
  0x3e   :  { %s808_s11 = sld [smem:[#allocation5 + $0x9]]  ;;  %s810_s12 = sld [smem:[#allocation5 + $0xa]]  ;;  %v223_v30 = vstv %s784_s26  ;;  %v227_v31 = vstv %s786_s27 }
  0x3f   :  { %s812_s13 = sld [smem:[#allocation5 + $0xb]]  ;;  %s814_s14 = sld [smem:[#allocation5 + $0xc]]  ;;  %v231_v32 = vstv %s788_s28  ;;  %v238_v34 = vstv %s792_s29 }
  0x40   :  { %s816_s15 = sld [smem:[#allocation5 + $0xd]]  ;;  %s818_s16 = sld [smem:[#allocation5 + $0xe]]  ;;  %v245_v35 = vstv %s794_s30  ;;  %v252_v36 = vstv %s796_s8 }
  0x41   :  { %557 = vmatpush3.bf16.xpose.msk.msra.mxu0 %vm714_vm1, %v555_v8  ;;  %s820_s17 = sld [smem:[#allocation5 + $0xf]]  ;;  %s822_s4 = sld [smem:[#allocation5 + $0x10]]  ;;  %v235_v33 = vstv %s790_s0  ;;  %v270_v38 = vstv %s800_s9 }
  0x42   :  { %558 = vmatprep.subr.bf16.mxu0 %v651_v2  ;;  %s824_s5 = sld [smem:[#allocation5 + $0x11]]  ;;  %s826_s18 = sld [smem:[#allocation5 + $0x12]]  ;;  %v259_v37 = vstv %s798_s1  ;;  %v273_v39 = vstv %s802_s3 }
  0x43   :  { %s828_s19 = sld [smem:[#allocation5 + $0x13]]  ;;  %s830_s20 = sld [smem:[#allocation5 + $0x14]]  ;;  %v280_v40 = vstv %s804_s2  ;;  %v287_v41 = vstv %s806_s10 }
  0x44   :  { %s832_s21 = sld [smem:[#allocation5 + $0x15]]  ;;  %s834_s22 = sld [smem:[#allocation5 + $0x16]]  ;;  %v294_v42 = vstv %s808_s11  ;;  %v305_v43 = vstv %s810_s12 }
  0x45   :  { %s839_s23 = sld [smem:[#allocation7]]  ;;  %s841_s7 = sld [smem:[#allocation5 + $0x17]]  ;;  %v308_v44 = vstv %s812_s13  ;;  %v315_v45 = vstv %s814_s14 }
  0x46   :  { %s847_s6 = sld [smem:[#allocation5 + $0x18]]  ;;  %s853_s24 = sld [smem:[#allocation7 + $0x1]]  ;;  %v322_v46 = vstv %s816_s15  ;;  %v329_v47 = vstv %s818_s16 }
  0x47   :  { %s855_s25 = sld [smem:[#allocation7 + $0x2]]  ;;  %s861_s26 = sld [smem:[#allocation7 + $0x3]]  ;;  %v340_v48 = vstv %s820_s17  ;;  %v343_v49 = vstv %s822_s4 }
  0x48   :  { %s867_s27 = sld [smem:[#allocation8]]  ;;  %v350_v50 = vstv %s824_s5  ;;  %s873_s28 = sld [smem:[#allocation8 + $0x1]]  ;;  %v357_v52 = vstv %s826_s18 }
  0x49   :  { %561 = vmatpush3.bf16.xpose.msk.msra.mxu0 %vm714_vm1, %v559_v11  ;;  %v364_v53 = vstv %s828_s19  ;;  %v375_v54 = vstv %s830_s20  ;;  %s907_s0 = sld [smem:[#allocation8 + $0x2]]  ;;  %s917_s29 = sld [smem:[#allocation7 + $0x4]] }
  0x4a   :  { %562 = vmatprep.subr.bf16.mxu0 %v651_v2  ;;  %v378_v55 = vstv %s832_s21  ;;  %v385_v63 = vstv %s834_s22  ;;  %s919_s30 = sld [smem:[#allocation8 + $0x3]]  ;;  %s954_s1 = sld [smem:[#allocation13_spill]] }
  0x4b   :  { %v266_v62 = vstv %s839_s23  ;;  %v392_v0 = vstv %s841_s7  ;;  %s497_s7 = sld [smem:[#allocation8 + $0x4]]  ;;  %s955_s2 = sld [smem:[#allocation14_spill]] }
  0x4c   :  { %v301_v6 = vstv %s853_s24  ;;  %v399_v8 = vstv %s847_s6 }
  0x4d   :  { %v336_v7 = vstv %s855_s25  ;;  %v371_v12 = vstv %s861_s26 }
  0x4e   :  { %v410_v16 = vstv %s867_s27 }
  0x51   :  { %565 = vmatpush3.bf16.xpose.msk.msra.mxu0 %vm714_vm1, %v563_v14 }
  0x52   :  { %566 = vmatprep.subr.bf16.mxu0 %v651_v2 }
  0x59   :  { %569 = vmatpush3.bf16.xpose.msk.msra.mxu0 %vm714_vm1, %v567_v17 }
  0x5a   :  { %570 = vmatprep.subr.bf16.mxu0 %v651_v2 }
  0x61   :  { %573 = vmatpush3.bf16.xpose.msk.msra.mxu0 %vm714_vm1, %v571_v20  ;;  %v413_v20 = vstv %s873_s28 }
  0x62   :  { %574 = vmatprep.subr.bf16.mxu0 %v651_v2 }
  0x69   :  { %577 = vmatpush3.bf16.xpose.msk.msra.mxu0 %vm714_vm1, %v575_v23 }
  0x6a   :  { %578 = vmatprep.subr.bf16.mxu0 %v651_v2 }
  0x71   :  { %581 = vmatpush3.bf16.xpose.msk.msra.mxu0 %vm714_vm1, %v579_v26 }
  0x78   :  { %548 = vmatmul.mubr.msk.f32.vlgmr.msra.gmra.mrb[0].mxu0 %vm92_vm0, %v75_v27 }
 0x14b   :  { %v210_v51 = vpop.f32.mrb[0].mxu0 }
 0x14c   :  { %v216_v56 = vadd.f32 %v215_v28, %v210_v51  ;;  %v220_v57 = vadd.f32 %v219_v29, %v210_v51  ;;  %v224_v58 = vadd.f32 %v223_v30, %v210_v51  ;;  %v228_v59 = vadd.f32 %v227_v31, %v210_v51  ;;  %v549_v60 = vpop.f32.mrb[1].mxu0 }
 0x14d   :  { %v232_v61 = vadd.f32 %v231_v32, %v210_v51 }
 0x14e   :  { %v882_v1 = vmax.f32 %v216_v56, 0.0  ;;  %v221_v2 = vmax.f32 %v220_v57, 0.0  ;;  %v225_v3 = vmax.f32 %v224_v58, 0.0  ;;  %v884_v4 = vmax.f32 %v228_v59, 0.0 }
 0x14f   :  { %v886_v5 = vmax.f32 %v232_v61, 0.0 }
 0x150   :  { %v239_v9 = vmul.f32 %v238_v34, %v221_v2  ;;  %v246_v10 = vmul.f32 %v245_v35, %v225_v3  ;;  %v253_v11 = vmul.f32 %v252_v36, %v884_v4  ;;  %v274_v14 = vmul.f32 %v273_v39, %v221_v2 }
 0x151   :  { %v260_v13 = vmul.f32 %v259_v37, %v886_v5  ;;  %v281_v15 = vmul.f32 %v280_v40, %v225_v3  ;;  %v236_v17 = vmul.f32 %v235_v33, %v882_v1  ;;  %v271_v19 = vmul.f32 %v270_v38, %v882_v1 }
 0x152   :  { %v241_v18 = vrot.slane %v239_v9, 1  ;;  %v248_v21 = vrot.slane %v246_v10, 2  ;;  %v276_v22 = vrot.slane %v274_v14, 1  ;;  %v288_v23 = vmul.f32 %v287_v41, %v884_v4 }
 0x153   :  { %v295_v24 = vmul.f32 %v294_v42, %v886_v5  ;;  %v255_v26 = vrot.slane %v253_v11, 3  ;;  %v262_v27 = vrot.slane %v260_v13, 4  ;;  %v309_v28 = vmul.f32 %v308_v44, %v221_v2 }
 0x154   :  { %v243_v25 = vadd.f32 %v241_v18, %v236_v17  ;;  %v278_v29 = vadd.f32 %v276_v22, %v271_v19  ;;  %v283_v30 = vrot.slane %v281_v15, 2  ;;  %v306_v31 = vmul.f32 %v305_v43, %v882_v1 }
 0x155   :  { %v316_v32 = vmul.f32 %v315_v45, %v225_v3  ;;  %v311_v34 = vrot.slane %v309_v28, 1  ;;  %v323_v35 = vmul.f32 %v322_v46, %v884_v4  ;;  %v330_v36 = vmul.f32 %v329_v47, %v886_v5 }
 0x156   :  { %v250_v33 = vadd.f32 %v248_v21, %v243_v25  ;;  %v285_v37 = vadd.f32 %v283_v30, %v278_v29  ;;  %v290_v38 = vrot.slane %v288_v23, 3  ;;  %v297_v39 = vrot.slane %v295_v24, 4 }
 0x157   :  { %v344_v40 = vmul.f32 %v343_v49, %v221_v2  ;;  %v313_v42 = vadd.f32 %v311_v34, %v306_v31  ;;  %v318_v44 = vrot.slane %v316_v32, 2  ;;  %v351_v51 = vmul.f32 %v350_v50, %v225_v3 }
 0x158   :  { %v257_v41 = vadd.f32 %v255_v26, %v250_v33  ;;  %v292_v56 = vadd.f32 %v290_v38, %v285_v37  ;;  %v341_v43 = vmul.f32 %v340_v48, %v882_v1  ;;  %v358_v57 = vmul.f32 %v357_v52, %v884_v4 }
 0x159   :  { %v346_v45 = vrot.slane %v344_v40, 1  ;;  %v320_v47 = vadd.f32 %v318_v44, %v313_v42  ;;  %v325_v58 = vrot.slane %v323_v35, 3  ;;  %v332_v49 = vrot.slane %v330_v36, 4 }
 0x15a   :  { %v264_v46 = vadd.f32 %v262_v27, %v257_v41  ;;  %v299_v59 = vadd.f32 %v297_v39, %v292_v56  ;;  %v353_v61 = vrot.slane %v351_v51, 2  ;;  %v365_v50 = vmul.f32 %v364_v53, %v886_v5 }
 0x15b   :  { %v348_v60 = vadd.f32 %v346_v45, %v341_v43  ;;  %v327_v10 = vadd.f32 %v325_v58, %v320_v47  ;;  %v379_v48 = vmul.f32 %v378_v55, %v221_v2  ;;  %v386_v52 = vmul.f32 %v385_v63, %v225_v3 }
 0x15c   :  { %v267_v9 = vadd.f32 %v266_v62, %v264_v46  ;;  %v302_v11 = vadd.f32 %v301_v6, %v299_v59  ;;  %v360_v14 = vrot.slane %v358_v57, 3  ;;  %v376_v15 = vmul.f32 %v375_v54, %v882_v1 }
 0x15d   :  { %v355_v13 = vadd.f32 %v353_v61, %v348_v60  ;;  %v334_v62 = vadd.f32 %v332_v49, %v327_v10  ;;  %v381_v17 = vrot.slane %v379_v48, 1  ;;  %v393_v55 = vmul.f32 %v392_v0, %v884_v4 }
 0x15e   :  { %v268_v53 = vmax.f32 %v267_v9, 0.0  ;;  %v303_v63 = vmax.f32 %v302_v11, 0.0  ;;  %v367_v3 = vrot.slane %v365_v50, 4  ;;  %v400_v6 = vmul.f32 %v399_v8, %v886_v5 }
 0x15f   :  { %v362_v2 = vadd.f32 %v360_v14, %v355_v13  ;;  %v337_v54 = vadd.f32 %v336_v7, %v334_v62  ;;  %v383_v1 = vadd.f32 %v381_v17, %v376_v15  ;;  %v388_v18 = vrot.slane %v386_v52, 2 }
 0x160   :  { %v411_v19 = vmul.f32 %v410_v16, %v268_v53  ;;  %v414_v22 = vmul.f32 %v413_v20, %v303_v63  ;;  %v417_v23 = vstv %s907_s0  ;;  %v395_v24 = vrot.slane %v393_v55, 3 }
 0x161   :  { %v369_v21 = vadd.f32 %v367_v3, %v362_v2  ;;  %v338_v0 = vmax.f32 %v337_v54, 0.0  ;;  %v390_v4 = vadd.f32 %v388_v18, %v383_v1  ;;  %v402_v5 = vrot.slane %v400_v6, 4 }
 0x162   :  { %v415_v26 = vadd.f32 %v414_v22, %v411_v19  ;;  %v406_v28 = vstv %s917_s29  ;;  %v421_v29 = vstv %s919_s30  ;;  %v425_v33 = vstv %s497_s7 }
 0x163   :  { %v372_v25 = vadd.f32 %v371_v12, %v369_v21  ;;  %v397_v27 = vadd.f32 %v395_v24, %v390_v4  ;;  %v418_v8 = vmul.f32 %v417_v23, %v338_v0  ;;  %v429_v36 = vstv %s954_s1 }
 0x165   :  { %v373_v7 = vmax.f32 %v372_v25, 0.0  ;;  %v404_v30 = vadd.f32 %v402_v5, %v397_v27  ;;  %v419_v31 = vadd.f32 %v418_v8, %v415_v26 }
 0x167   :  { %v407_v32 = vadd.f32 %v406_v28, %v404_v30  ;;  %v422_v16 = vmul.f32 %v421_v29, %v373_v7 }
 0x169   :  { %v408_v20 = vmax.f32 %v407_v32, 0.0  ;;  %v423_v34 = vadd.f32 %v422_v16, %v419_v31 }
 0x16b   :  { %v426_v35 = vmul.f32 %v425_v33, %v408_v20 }
 0x16d   :  { %v427_v12 = vadd.f32 %v426_v35, %v423_v34 }
 0x16f   :  { %v430_v37 = vadd.f32 %v429_v36, %v427_v12 }
 0x171   :  { %v431_v38 = vsub.f32 0.0, %v430_v37 }
 0x173   :  { %v432_v39 = vmul.f32 1.442695, %v431_v38 }
 0x175   :  { %589 = vpow2.f32 %v432_v39 }
 0x17f   :  { %v590_v40 = vpop.eup %589 }
 0x180   :  { %v434_v41 = vadd.f32 1.0, %v590_v40 }
 0x182   :  { %591 = vrcp.f32 %v434_v41 }
 0x18c   :  { %v592_v42 = vpop.eup %591 }
 0x18d   :  { %437 = vst [vmem:[%s955_s2] sm:$0x1] %v592_v42 }
 0x18e   :  { %442 = vsyncpa [#allocation4], 1 }
 0x18f   :  { %443 = vsyncpa [#allocation6], 1 }
 0x190   :  { %444 = vsyncpa [#allocation9], 1 }

</bundles_post_ra>
